<compile_context>
chip_gen: v7x
topology: tpu7x:2x2x1
jax: 0.10.0
libtpu: 0.0.40
codegen_flags: <defaults>
</compile_context>

<pallas_src>
import functools

import jax
import jax.numpy as jnp
from jax.experimental import pallas as pl
from jax.experimental.pallas import tpu as pltpu


def additive_attention_kernel(vl_ref,                    # SMEM (B,) int32 (scalar prefetch)
                              q_ref, k_ref, v_ref,       # (BT,Q,QS) (BT,K,KS) (BT,K,DV)
                              wq_ref, wk_ref, wv_ref,    # (QS,H) (KS,H) (H,1)
                              out_ref, attn_ref,         # (BT,Q,DV) (BT,Q,K)
                              *, compute_dtype=jnp.float32):
    BT, Q, QS = q_ref.shape
    _, K, KS = k_ref.shape
    H = wq_ref.shape[1]
    cd = compute_dtype

    q2 = q_ref[...].reshape(BT * Q, QS)
    k2 = k_ref[...].reshape(BT * K, KS)

    # --- projections ---
    if QS == KS:
        # Fused: one MXU launch instead of two (push/drain latency dominates
        # at small shapes). 2x redundant FLOPs; keep separate at large shapes.
        x_all = jnp.concatenate([q2, k2], axis=0)                    # (BT*(Q+K), QS)
        w_all = jnp.concatenate([wq_ref[...], wk_ref[...]], axis=1)  # (QS, 2H)
        y = jnp.dot(x_all.astype(cd), w_all.astype(cd),
                    preferred_element_type=jnp.float32)              # (BT*(Q+K), 2H)
        qh = y[:BT * Q, :H]                                          # (BT*Q, H)
        kh = y[BT * Q:, H:]                                          # (BT*K, H)
    else:
        qh = jnp.dot(q2.astype(cd), wq_ref[...].astype(cd),
                     preferred_element_type=jnp.float32)
        kh = jnp.dot(k2.astype(cd), wk_ref[...].astype(cd),
                     preferred_element_type=jnp.float32)

    # --- additive features + score reduction, K-lane-dense layout ---
    # feats[b,q,h,k] = tanh(qh[b,q,h] + kh[b,k,h]); K on lanes, H on sublanes.
    kh_t = jnp.swapaxes(kh.reshape(BT, K, H), 1, 2)                  # (BT, H, K) one XLU transpose
    qh4 = qh.reshape(BT, Q, H)[:, :, :, None]                        # (BT, Q, H, 1)
    feats = jnp.tanh(qh4 + kh_t[:, None, :, :])                      # (BT, Q, H, K)
    # TODO(synk): cast the tanh path to bf16 on v6e/v7x once tolerance allows.
    scores = jnp.sum(feats * wv_ref[...].reshape(1, 1, H, 1), axis=2)  # (BT, Q, K) sublane reduce

    # --- masked softmax over keys (mask value -1e6, matching the reference) ---
    b0 = pl.program_id(0) * BT
    col = jax.lax.broadcasted_iota(jnp.int32, (BT, Q, K), 2)
    b_iota = jax.lax.broadcasted_iota(jnp.int32, (BT, Q, K), 0)
    neg = jnp.float32(-1000000.0)
    for i in range(BT):                       # BT is static; per-batch scalar from SMEM
        vl = vl_ref[b0 + i]
        keep = jnp.logical_or(b_iota != i, col < vl)
        scores = jnp.where(keep, scores, neg)

    m = jnp.max(scores, axis=-1, keepdims=True)
    e = jnp.exp(scores - m)
    s = jnp.sum(e, axis=-1, keepdims=True)
    inv = pl.reciprocal(s, approx=True)        # EUP slot (otherwise idle here)
    inv = inv * (2.0 - s * inv)                # one Newton step -> full f32 accuracy
    attn = e * inv                             # (BT, Q, K)

    attn_ref[...] = attn.astype(attn_ref.dtype)
    out_ref[...] = jnp.einsum('bqk,bkd->bqd', attn, v_ref[...],
                              preferred_element_type=jnp.float32).astype(out_ref.dtype)


def additive_attention(queries, keys, values, valid_lens, W_q, W_k, w_v,
                       *, batch_tile=None, compute_dtype=jnp.float32):
    B, Q, QS = queries.shape
    _, K, KS = keys.shape
    _, _, DV = values.shape
    H = W_q.shape[1]

    # Batch tile: whole batch in one block at toy sizes (per-grid-step overhead
    # dominates), split in two blocks for megacore once per-core work is
    # substantial. TODO(synk): Q/K tiling (flash-style) for large sequences.
    if batch_tile is None:
        per_batch_bytes = 4 * (Q * K * H + 2 * Q * K + Q * QS + K * KS + K * DV + Q * DV)
        if B > 1 and B % 2 == 0 and B * per_batch_bytes >= (1 << 20):
            batch_tile = B // 2
        else:
            batch_tile = B
    bt = batch_tile
    assert B % bt == 0, "batch_tile must divide batch"

    vl = valid_lens.astype(jnp.int32).reshape(B)   # scalar-prefetch -> SMEM
    wv_t = w_v.reshape(1, H).T                     # (H, 1): H stays on sublanes in-kernel

    kernel = functools.partial(additive_attention_kernel, compute_dtype=compute_dtype)

    out, attn = pl.pallas_call(
        kernel,
        grid_spec=pltpu.PrefetchScalarGridSpec(
            num_scalar_prefetch=1,
            grid=(B // bt,),
            # index_maps receive the scalar-prefetch ref as a trailing arg.
            in_specs=[
                pl.BlockSpec((bt, Q, QS), lambda b, vl: (b, 0, 0)),
                pl.BlockSpec((bt, K, KS), lambda b, vl: (b, 0, 0)),
                pl.BlockSpec((bt, K, DV), lambda b, vl: (b, 0, 0)),
                pl.BlockSpec((QS, H),     lambda b, vl: (0, 0)),   # weights stay resident
                pl.BlockSpec((KS, H),     lambda b, vl: (0, 0)),
                pl.BlockSpec((H, 1),      lambda b, vl: (0, 0)),
            ],
            out_specs=[
                pl.BlockSpec((bt, Q, DV), lambda b, vl: (b, 0, 0)),
                pl.BlockSpec((bt, Q, K),  lambda b, vl: (b, 0, 0)),
            ],
        ),
        out_shape=(
            jax.ShapeDtypeStruct((B, Q, DV), jnp.float32),
            jax.ShapeDtypeStruct((B, Q, K), jnp.float32),
        ),
        compiler_params=pltpu.CompilerParams(
            dimension_semantics=("parallel",)),
        # TODO(synk): raise vmem_limit_bytes when enlarging Q/K tiles
        # (16 MiB default on v5e, 32 MiB on v6e/v7x).
    )(vl, queries, keys, values, W_q, W_k, wv_t)
    return out, attn


def reference(queries, keys, values, valid_lens, W_q, W_k, w_v):
    qh = queries @ W_q                                    # (B,Q,H)
    kh = keys @ W_k                                       # (B,K,H)
    feats = jnp.tanh(qh[:, :, None, :] + kh[:, None, :, :])
    scores = jnp.einsum('bqkh,h->bqk', feats, w_v[0])
    col = jnp.arange(scores.shape[-1])[None, None, :]
    mask = col < valid_lens[:, None, None]
    scores = jnp.where(mask, scores, -1000000.0)
    attn = jax.nn.softmax(scores, axis=-1)
    return jnp.einsum('bqk,bkd->bqd', attn, values), attn


if __name__ == "__main__":
    # sizes implied by the module's forward
    B, Q, K = 2, 8, 8
    QUERY_SIZE, KEY_SIZE, NUM_HIDDENS, VALUE_DIM = 16, 16, 32, 16

    key = jax.random.PRNGKey(0)
    kq, kk, kv, kwq, kwk, kwv = jax.random.split(key, 6)

    queries = jax.random.normal(kq, (B, Q, QUERY_SIZE), dtype=jnp.float32)
    keys = jax.random.normal(kk, (B, K, KEY_SIZE), dtype=jnp.float32)
    values = jax.random.normal(kv, (B, K, VALUE_DIM), dtype=jnp.float32)
    valid_lens = jnp.array([3, 8], dtype=jnp.int32)

    # nn.Linear weights stored transposed so the kernel does x @ W directly.
    W_q = 0.1 * jax.random.normal(kwq, (QUERY_SIZE, NUM_HIDDENS), dtype=jnp.float32)
    W_k = 0.1 * jax.random.normal(kwk, (KEY_SIZE, NUM_HIDDENS), dtype=jnp.float32)
    w_v = 0.1 * jax.random.normal(kwv, (1, NUM_HIDDENS), dtype=jnp.float32)

    out, attn = additive_attention(queries, keys, values, valid_lens, W_q, W_k, w_v)
    jax.block_until_ready((out, attn))

    ref_out, ref_attn = reference(queries, keys, values, valid_lens, W_q, W_k, w_v)
    assert jnp.allclose(out, ref_out, atol=1e-4, rtol=1e-4), "output mismatch"
    assert jnp.allclose(attn, ref_attn, atol=1e-4, rtol=1e-4), "attention mismatch"

    print("KERNEL_OK")
</pallas_src>

<mosaic_0001>
module attributes {stable_mosaic.version = 11 : i64} {
  func.func @additive_attention_kernel(%arg0: i32, %arg1: memref<2xi32, #tpu.memory_space<smem>>, %arg2: memref<2x8x16xf32, #tpu.memory_space<vmem>>, %arg3: memref<2x8x16xf32, #tpu.memory_space<vmem>>, %arg4: memref<2x8x16xf32, #tpu.memory_space<vmem>>, %arg5: memref<16x32xf32, #tpu.memory_space<vmem>>, %arg6: memref<16x32xf32, #tpu.memory_space<vmem>>, %arg7: memref<32x1xf32, #tpu.memory_space<vmem>>, %arg8: memref<2x8x16xf32, #tpu.memory_space<vmem>>, %arg9: memref<2x8x8xf32, #tpu.memory_space<vmem>>) attributes {dimension_semantics = [#tpu.dimension_semantics<parallel>], iteration_bounds = array<i64: 1>, scalar_prefetch = 1 : i64, scratch_operands = 0 : i64, tpu.core_type = #tpu.core_type<tc>, window_params = [{transform_indices = @transform_0, window_bounds = array<i64: 2, 8, 16>}, {transform_indices = @transform_1, window_bounds = array<i64: 2, 8, 16>}, {transform_indices = @transform_2, window_bounds = array<i64: 2, 8, 16>}, {pipeline_mode = #tpu.pipeline_mode<synchronous>, transform_indices = @transform_3, window_bounds = array<i64: 16, 32>}, {pipeline_mode = #tpu.pipeline_mode<synchronous>, transform_indices = @transform_4, window_bounds = array<i64: 16, 32>}, {pipeline_mode = #tpu.pipeline_mode<synchronous>, transform_indices = @transform_5, window_bounds = array<i64: 32, 1>}, {transform_indices = @transform_6, window_bounds = array<i64: 2, 8, 16>}, {transform_indices = @transform_7, window_bounds = array<i64: 2, 8, 8>}]} {
    %c0 = arith.constant 0 : index
    %c0_0 = arith.constant 0 : index
    %c0_1 = arith.constant 0 : index
    %0 = vector.load %arg2[%c0, %c0_0, %c0_1] : memref<2x8x16xf32, #tpu.memory_space<vmem>>, vector<2x8x16xf32>
    %1 = vector.shape_cast %0 : vector<2x8x16xf32> to vector<16x16xf32>
    %c0_2 = arith.constant 0 : index
    %c0_3 = arith.constant 0 : index
    %c0_4 = arith.constant 0 : index
    %2 = vector.load %arg3[%c0_2, %c0_3, %c0_4] : memref<2x8x16xf32, #tpu.memory_space<vmem>>, vector<2x8x16xf32>
    %3 = vector.shape_cast %2 : vector<2x8x16xf32> to vector<16x16xf32>
    %4 = tpu.concatenate %1, %3 in 0 : vector<16x16xf32>, vector<16x16xf32> -> vector<32x16xf32>
    %c0_5 = arith.constant 0 : index
    %c0_6 = arith.constant 0 : index
    %5 = vector.load %arg5[%c0_5, %c0_6] : memref<16x32xf32, #tpu.memory_space<vmem>>, vector<16x32xf32>
    %c0_7 = arith.constant 0 : index
    %c0_8 = arith.constant 0 : index
    %6 = vector.load %arg6[%c0_7, %c0_8] : memref<16x32xf32, #tpu.memory_space<vmem>>, vector<16x32xf32>
    %7 = tpu.concatenate %5, %6 in 1 : vector<16x32xf32>, vector<16x32xf32> -> vector<16x64xf32>
    %cst = arith.constant dense<0.000000e+00> : vector<32x64xf32>
    %8 = tpu.matmul %4, %7, %cst {dimension_numbers = #tpu.dot_dimension_numbers<[1], [0], [0], [1], [0, 0, 1, 1], [], []>} : vector<32x16xf32>, vector<16x64xf32>, vector<32x64xf32> -> vector<32x64xf32>
    %9 = vector.extract_strided_slice %8 {offsets = [0, 0], sizes = [16, 32], strides = [1, 1]} : vector<32x64xf32> to vector<16x32xf32>
    %10 = vector.extract_strided_slice %8 {offsets = [16, 32], sizes = [16, 32], strides = [1, 1]} : vector<32x64xf32> to vector<16x32xf32>
    %11 = vector.shape_cast %10 : vector<16x32xf32> to vector<2x8x32xf32>
    %12 = tpu.transpose %11, [0, 2, 1] : vector<2x8x32xf32> -> vector<2x32x8xf32>
    %13 = vector.shape_cast %9 : vector<16x32xf32> to vector<2x8x32xf32>
    %14 = vector.shape_cast %13 : vector<2x8x32xf32> to vector<2x8x32x1xf32>
    %15 = vector.shape_cast %12 : vector<2x32x8xf32> to vector<2x1x32x8xf32>
    %16 = vector.broadcast %14 : vector<2x8x32x1xf32> to vector<2x8x32x8xf32>
    %17 = vector.broadcast %15 : vector<2x1x32x8xf32> to vector<2x8x32x8xf32>
    %18 = arith.addf %16, %17 : vector<2x8x32x8xf32>
    %19 = math.tanh %18 : vector<2x8x32x8xf32>
    %c0_9 = arith.constant 0 : index
    %c0_10 = arith.constant 0 : index
    %20 = vector.load %arg7[%c0_9, %c0_10] : memref<32x1xf32, #tpu.memory_space<vmem>>, vector<32x1xf32>
    %21 = vector.shape_cast %20 : vector<32x1xf32> to vector<1x1x32x1xf32>
    %22 = vector.broadcast %21 : vector<1x1x32x1xf32> to vector<2x8x32x8xf32>
    %23 = arith.mulf %19, %22 : vector<2x8x32x8xf32>
    %cst_11 = arith.constant dense<0.000000e+00> : vector<2x8x8xf32>
    %24 = vector.multi_reduction <add>, %23, %cst_11 [2] : vector<2x8x32x8xf32> to vector<2x8x8xf32>
    %c2_i32 = arith.constant 2 : i32
    %25 = arith.muli %arg0, %c2_i32 : i32
    %26 = tpu.iota {dimensions = array<i32: 2>} : vector<2x8x8xi32>
    %27 = tpu.iota {dimensions = array<i32: 0>} : vector<2x8x8xi32>
    %c0_i32 = arith.constant 0 : i32
    %28 = arith.addi %25, %c0_i32 : i32
    %29 = arith.index_cast %28 : i32 to index
    %30 = memref.load %arg1[%29] : memref<2xi32, #tpu.memory_space<smem>>
    %c0_i32_12 = arith.constant 0 : i32
    %31 = vector.broadcast %c0_i32_12 : i32 to vector<2x8x8xi32>
    %32 = arith.cmpi ne, %27, %31 : vector<2x8x8xi32>
    %33 = vector.broadcast %30 : i32 to vector<2x8x8xi32>
    %34 = arith.cmpi slt, %26, %33 : vector<2x8x8xi32>
    %35 = arith.ori %32, %34 : vector<2x8x8xi1>
    %cst_13 = arith.constant -1.000000e+06 : f32
    %36 = vector.broadcast %cst_13 : f32 to vector<2x8x8xf32>
    %37 = arith.select %35, %24, %36 : vector<2x8x8xi1>, vector<2x8x8xf32>
    %c1_i32 = arith.constant 1 : i32
    %38 = arith.addi %25, %c1_i32 : i32
    %39 = arith.index_cast %38 : i32 to index
    %40 = memref.load %arg1[%39] : memref<2xi32, #tpu.memory_space<smem>>
    %c1_i32_14 = arith.constant 1 : i32
    %41 = vector.broadcast %c1_i32_14 : i32 to vector<2x8x8xi32>
    %42 = arith.cmpi ne, %27, %41 : vector<2x8x8xi32>
    %43 = vector.broadcast %40 : i32 to vector<2x8x8xi32>
    %44 = arith.cmpi slt, %26, %43 : vector<2x8x8xi32>
    %45 = arith.ori %42, %44 : vector<2x8x8xi1>
    %cst_15 = arith.constant -1.000000e+06 : f32
    %46 = vector.broadcast %cst_15 : f32 to vector<2x8x8xf32>
    %47 = arith.select %45, %37, %46 : vector<2x8x8xi1>, vector<2x8x8xf32>
    %cst_16 = arith.constant dense<0xFF800000> : vector<2x8xf32>
    %48 = vector.multi_reduction <maximumf>, %47, %cst_16 [2] : vector<2x8x8xf32> to vector<2x8xf32>
    %49 = vector.shape_cast %48 : vector<2x8xf32> to vector<2x8x1xf32>
    %50 = vector.broadcast %49 : vector<2x8x1xf32> to vector<2x8x8xf32>
    %51 = arith.subf %47, %50 : vector<2x8x8xf32>
    %52 = math.exp %51 : vector<2x8x8xf32>
    %cst_17 = arith.constant dense<0.000000e+00> : vector<2x8xf32>
    %53 = vector.multi_reduction <add>, %52, %cst_17 [2] : vector<2x8x8xf32> to vector<2x8xf32>
    %54 = vector.shape_cast %53 : vector<2x8xf32> to vector<2x8x1xf32>
    %55 = tpu.reciprocal %54 {approx = true} : vector<2x8x1xf32> -> vector<2x8x1xf32>
    %56 = arith.mulf %54, %55 : vector<2x8x1xf32>
    %cst_18 = arith.constant 2.000000e+00 : f32
    %57 = vector.broadcast %cst_18 : f32 to vector<2x8x1xf32>
    %58 = arith.subf %57, %56 : vector<2x8x1xf32>
    %59 = arith.mulf %55, %58 : vector<2x8x1xf32>
    %60 = vector.broadcast %59 : vector<2x8x1xf32> to vector<2x8x8xf32>
    %61 = arith.mulf %52, %60 : vector<2x8x8xf32>
    %c0_19 = arith.constant 0 : index
    %c0_20 = arith.constant 0 : index
    %c0_21 = arith.constant 0 : index
    %62 = vector.load %arg9[%c0_19, %c0_20, %c0_21] : memref<2x8x8xf32, #tpu.memory_space<vmem>>, vector<2x8x8xf32>
    tpu.vector_store %arg9[%c0_19, %c0_20, %c0_21], %61 {strides = array<i32>} : memref<2x8x8xf32, #tpu.memory_space<vmem>>, vector<2x8x8xf32>,
    %c0_22 = arith.constant 0 : index
    %c0_23 = arith.constant 0 : index
    %c0_24 = arith.constant 0 : index
    %63 = vector.load %arg4[%c0_22, %c0_23, %c0_24] : memref<2x8x16xf32, #tpu.memory_space<vmem>>, vector<2x8x16xf32>
    "tpu.trace_start"() <{level = 10 : i32, message = "bqk,bkd->bqd"}> : () -> ()
    %cst_25 = arith.constant dense<0.000000e+00> : vector<2x8x16xf32>
    %64 = tpu.matmul %61, %63, %cst_25 {dimension_numbers = #tpu.dot_dimension_numbers<[2], [1], [1], [2], [0, 0, 0, 1, 1, 2], [0], [0]>} : vector<2x8x8xf32>, vector<2x8x16xf32>, vector<2x8x16xf32> -> vector<2x8x16xf32>
    "tpu.trace_stop"() : () -> ()
    %c0_26 = arith.constant 0 : index
    %c0_27 = arith.constant 0 : index
    %c0_28 = arith.constant 0 : index
    %65 = vector.load %arg8[%c0_26, %c0_27, %c0_28] : memref<2x8x16xf32, #tpu.memory_space<vmem>>, vector<2x8x16xf32>
    tpu.vector_store %arg8[%c0_26, %c0_27, %c0_28], %64 {strides = array<i32>} : memref<2x8x16xf32, #tpu.memory_space<vmem>>, vector<2x8x16xf32>,
    return
  }
  func.func @transform_0(%arg0: i32, %arg1: memref<2xi32, #tpu.memory_space<smem>>) -> (i32, i32, i32) {
    %c0_i32 = arith.constant 0 : i32
    %c0_i32_0 = arith.constant 0 : i32
    %c0_i32_1 = arith.constant 0 : i32
    return %arg0, %c0_i32, %c0_i32_0 : i32, i32, i32
  }
  func.func @transform_1(%arg0: i32, %arg1: memref<2xi32, #tpu.memory_space<smem>>) -> (i32, i32, i32) {
    %c0_i32 = arith.constant 0 : i32
    %c0_i32_0 = arith.constant 0 : i32
    %c0_i32_1 = arith.constant 0 : i32
    return %arg0, %c0_i32, %c0_i32_0 : i32, i32, i32
  }
  func.func @transform_2(%arg0: i32, %arg1: memref<2xi32, #tpu.memory_space<smem>>) -> (i32, i32, i32) {
    %c0_i32 = arith.constant 0 : i32
    %c0_i32_0 = arith.constant 0 : i32
    %c0_i32_1 = arith.constant 0 : i32
    return %arg0, %c0_i32, %c0_i32_0 : i32, i32, i32
  }
  func.func @transform_3(%arg0: i32, %arg1: memref<2xi32, #tpu.memory_space<smem>>) -> (i32, i32) {
    %c0_i32 = arith.constant 0 : i32
    %c0_i32_0 = arith.constant 0 : i32
    %c0_i32_1 = arith.constant 0 : i32
    return %c0_i32, %c0_i32_0 : i32, i32
  }
  func.func @transform_4(%arg0: i32, %arg1: memref<2xi32, #tpu.memory_space<smem>>) -> (i32, i32) {
    %c0_i32 = arith.constant 0 : i32
    %c0_i32_0 = arith.constant 0 : i32
    %c0_i32_1 = arith.constant 0 : i32
    return %c0_i32, %c0_i32_0 : i32, i32
  }
  func.func @transform_5(%arg0: i32, %arg1: memref<2xi32, #tpu.memory_space<smem>>) -> (i32, i32) {
    %c0_i32 = arith.constant 0 : i32
    %c0_i32_0 = arith.constant 0 : i32
    %c0_i32_1 = arith.constant 0 : i32
    return %c0_i32, %c0_i32_0 : i32, i32
  }
  func.func @transform_6(%arg0: i32, %arg1: memref<2xi32, #tpu.memory_space<smem>>) -> (i32, i32, i32) {
    %c0_i32 = arith.constant 0 : i32
    %c0_i32_0 = arith.constant 0 : i32
    %c0_i32_1 = arith.constant 0 : i32
    return %arg0, %c0_i32, %c0_i32_0 : i32, i32, i32
  }
  func.func @transform_7(%arg0: i32, %arg1: memref<2xi32, #tpu.memory_space<smem>>) -> (i32, i32, i32) {
    %c0_i32 = arith.constant 0 : i32
    %c0_i32_0 = arith.constant 0 : i32
    %c0_i32_1 = arith.constant 0 : i32
    return %arg0, %c0_i32, %c0_i32_0 : i32, i32, i32
  }
}

</mosaic_0001>

<bundles_post_ra>
// kernel: tpu_custom_call.1
= control target key start
LH: loop header
LB: loop body
LE: loop exit
PB: predicated region body
PF: predicated region fallthrough
CT: control target
= control target key end

     0   :  { %s2381_s0 = inlined_call_operand.hbm [shape: s32[2], index: 0, kind: input, shape index: {}]   ;;  %s2382_s1 = inlined_call_operand.vmem [shape: f32[2,8,16], index: 1, kind: input, shape index: {}]   ;;  %s2383_s2 = inlined_call_operand.vmem [shape: f32[2,8,16], index: 2, kind: input, shape index: {}]   ;;  %s2384_s3 = inlined_call_operand.hbm [shape: f32[2,8,16], index: 3, kind: input, shape index: {}]   ;;  %s2385_s4 = inlined_call_operand.vmem [shape: f32[16,32], index: 4, kind: input, shape index: {}]   ;;  %s2386_s5 = inlined_call_operand.hbm [shape: f32[16,32], index: 5, kind: input, shape index: {}]   ;;  %s2387_s6 = inlined_call_operand.vmem [shape: f32[32,1], index: 6, kind: input, shape index: {}]   ;;  %s2388_s7 = inlined_call_operand.hbm [shape: f32[2,8,16], index: 7, kind: output, shape index: {0}]   ;;  %s2389_s8 = inlined_call_operand.hbm [shape: f32[2,8,8], index: 8, kind: output, shape index: {1}]  }
   0x1   :  { %s1445_s29 = scalar_lea.hbm %s2381_s0, 16 }
   0x2   :  { %p1446_p0 = scmp.ne.s32.totalorder %s2381_s0, %s1445_s29  ;;  %p1449_p1 = scmp.lt.u32.totalorder %s1445_s29, %s2381_s0 }
   0x4   :  { %p1451_p2 = pnand %p1449_p1, %p1446_p0 }
   0x6   :  { %1454 = shalt.err (!%p1451_p2)  }
   0x7   :  { %s1553_s12 = smov [#allocation3]  }
   0x8   :  { %15 = dma.hbm_to_smem %s2381_s0, 16, %s1553_s12, [#allocation2] }
   0x9   :  { %1543 = dma.done.wait [#allocation2], 16 }
   0xa   :  { %1544 = vsyncadd [#allocation2], 4294967280 }
   0xb   :  { %17 = sfence }
   0xc   :  { %18 = vsyncpa [#allocation5], 0 }
   0xd   :  { %19 = vsyncpa [#allocation8], 0 }
   0xe   :  { %20 = vsyncpa [#allocation6], 0 }
   0xf   :  { %21 = vsyncpa [#allocation11], 0  ;;  %s1554_s15 = smov [#allocation4]   ;;  %s1455_s19 = scalar_lea.hbm %s2384_s3, 256 }
  0x10   :  { %s31_s16 = sshll.u32 %s1554_s15, 4  ;;  %p1456_p3 = scmp.ne.s32.totalorder %s2384_s3, %s1455_s19  ;;  %s32_s16 = int_to_ptr.vmem [resolvable:$true] %s31_s16 }
  0x11   :  { %p1459_p4 = scmp.lt.u32.totalorder %s1455_s19, %s2384_s3 }
  0x13   :  { %p1461_p5 = pnand %p1459_p4, %p1456_p3 }
  0x15   :  { %1464 = shalt.err (!%p1461_p5)
}
  0x16   :  { %s1465_s23 = scalar_lea.vmem %s32_s16, 256  ;;  %p1470_p7 = scmp.lt.s32.totalorder %s32_s16, %s32_s16 }
  0x17   :  { %p1466_p6 = scmp.ne.s32.totalorder %s32_s16, %s1465_s23  ;;  %p1471_p8 = scmp.lt.s32.totalorder %s1465_s23, %s1465_s23 }
  0x19   :  { %p1472_p9 = por %p1471_p8, %p1470_p7 }
  0x1b   :  { %p1473_p10 = pnand %p1472_p9, %p1466_p6 }
  0x1d   :  { %1476 = shalt.err (!%p1473_p10)
}
  0x1e   :  { %s1555_s24 = smov 128   ;;  %s1556_s25 = smov 8  }
  0x1f   :  { %37 = dma.hbm_to_vmem [thread:$0]  %s2384_s3, 256, %s32_s16, [#allocation5], %s1555_s24, %s1555_s24, %s1556_s25  }
  0x20   :  { %s1557_s28 = smov [#allocation7]   ;;  %s1477_s10 = scalar_lea.hbm %s2386_s5, 256 }
  0x21   :  { %s45_s29 = sshll.u32 %s1557_s28, 4  ;;  %p1478_p11 = scmp.ne.s32.totalorder %s2386_s5, %s1477_s10  ;;  %s46_s29 = int_to_ptr.vmem [resolvable:$true] %s45_s29 }
  0x22   :  { %p1481_p12 = scmp.lt.u32.totalorder %s1477_s10, %s2386_s5 }
  0x24   :  { %p1483_p13 = pnand %p1481_p12, %p1478_p11 }
  0x26   :  { %1486 = shalt.err (!%p1483_p13)
}
  0x27   :  { %s1487_s15 = scalar_lea.vmem %s46_s29, 256  ;;  %p1492_p1 = scmp.lt.s32.totalorder %s46_s29, %s46_s29 }
  0x28   :  { %p1488_p0 = scmp.ne.s32.totalorder %s46_s29, %s1487_s15  ;;  %p1493_p2 = scmp.lt.s32.totalorder %s1487_s15, %s1487_s15 }
  0x2a   :  { %p1494_p3 = por %p1493_p2, %p1492_p1 }
  0x2c   :  { %p1495_p4 = pnand %p1494_p3, %p1488_p0 }
  0x2e   :  { %1498 = shalt.err (!%p1495_p4)
}
  0x2f   :  { %51 = dma.hbm_to_vmem [thread:$0]  %s2386_s5, 256, %s46_s29, [#allocation8], %s1555_s24, %s1555_s24, %s1556_s25  }
  0x30   :  { %1545 = dma.done.wait [#allocation5], 256  }
  0x31   :  { %1546 = vsyncadd [#allocation5], 4294967040 }
  0x32   :  { %1547 = dma.done.wait [#allocation8], 256  }
  0x33   :  { %1548 = vsyncadd [#allocation8], 4294967040  ;;  %vm79_vm0 = vcmask 130048   ;;  %v66_v0 = vld [vmem:[#allocation7] sm:$0xff]  ;;  %v67_v1 = vld [vmem:[#allocation7 + $0x8] sm:$0xff]  ;;  %s1558_s19 = smov 32   ;;  %v2390_v19 = vlaneseq }
  0x34   :  { %v1302_v2 = vpack.i.bf16 %v67_v1, %v66_v0  ;;  %v60_v3 = vld [vmem:[%s2382_s1] sm:$0xff]  ;;  %v1559_v5 = vmov 0   ;;  %v682_v6 = vld [vmem:[%s2387_s6 + $0x8] sm:$0xff]  ;;  %v683_v7 = vld [vmem:[%s2387_s6 + $0x10] sm:$0xff]  ;;  %vm76_vm1 = vcmask 261120   ;;  %vm769_vm2 = vcmask 64512  }
  0x35   :  { %1270 = vmatprep.mubr.msk.f32.mxu0 %vm79_vm0, %v60_v3  ;;  %v681_v4 = vld [vmem:[%s2387_s6] sm:$0xff]  ;;  %1308 = vset.pattern.permute.xlu0 %v1559_v5  ;;  %v65_v10 = vld [vmem:[%s2385_s4 + $0x8] sm:$0xff]  ;;  %v1684_v20 = vshrl.u32 %v2390_v19, 7  ;;  %v684_v56 = vld [vmem:[%s2387_s6 + $0x18] sm:$0xff]  ;;  %s1840_s6 = sld [smem:[#allocation3]]  ;;  %vm1002_vm3 = vcmask 1041409  }
  0x36   :  { %1303 = vrot.lane.b32.xlu0 %v1302_v2, %s1558_s19  ;;  %1307 = vset.pattern.permute.xlu1 %v1559_v5  ;;  %v64_v9 = vld [vmem:[%s2385_s4] sm:$0xff]  ;;  %v61_v16 = vld [vmem:[%s2382_s1 + $0x8] sm:$0xff]  ;;  %s1560_s1 = smov 96   ;;  %vm1004_vm4 = vcmask 1042434   ;;  %vm1006_vm5 = vcmask 1043459   ;;  %vm1008_vm6 = vcmask 1044484  }
  0x37   :  { %687 = vperm.xlu1 %1307, %v681_v4   ;;  %v62_v17 = vld [vmem:[%s2383_s2] sm:$0xff]  ;;  %v63_v18 = vld [vmem:[%s2383_s2 + $0x8] sm:$0xff]  ;;  %v251_v21 = vsub.s32 0, %v1684_v20  ;;  %v365_v23 = vsub.s32 6, %v1684_v20  ;;  %v384_v24 = vsub.s32 7, %v1684_v20  ;;  %v270_v27 = vsub.s32 1, %v1684_v20 }
  0x38   :  { %v289_v33 = vsub.s32 2, %v1684_v20  ;;  %v308_v37 = vsub.s32 3, %v1684_v20  ;;  %v327_v39 = vsub.s32 4, %v1684_v20  ;;  %v346_v41 = vsub.s32 5, %v1684_v20  ;;  %s1253_s14 = sld [smem:[#allocation3 + $0x1]]  ;;  %s1563_s15 = smov [#allocation10]  }
  0x39   :  { %vm1010_vm7 = vcmask 1045509   ;;  %vm1012_vm8 = vcmask 1046534   ;;  %vm1014_vm9 = vcmask 1047559   ;;  %vm1562_vm12 = vmmov 0   ;;  %s1232_s3 = sshll.u32 %s1563_s15, 4  ;;  %s1233_s3 = int_to_ptr.vmem [resolvable:$true] %s1232_s3 }
  0x3a   :  { %692 = vperm.xlu0 %1308, %v682_v6   ;;  %s1499_s16 = scalar_lea.vmem %s1233_s3, 256  ;;  %p1504_p6 = scmp.lt.s32.totalorder %s1233_s3, %s1233_s3 }
  0x3b   :  { %p1500_p5 = scmp.ne.s32.totalorder %s1233_s3, %s1499_s16  ;;  %p1505_p7 = scmp.lt.s32.totalorder %s1499_s16, %s1499_s16 }
  0x3d   :  { %p1506_p8 = por %p1505_p7, %p1504_p6 }
  0x3e   :  { %697 = vperm.xlu0 %1308, %v683_v7  }
  0x3f   :  { %p1507_p9 = pnand %p1506_p8, %p1500_p5 }
  0xa8   :  { %v1304_v8 = vpop.permute.xlu0 %1303 }
  0xa9   :  { %v1306_v11 = vunpack.i.h.bf16 %v1304_v8  ;;  %v1305_v12 = vunpack.i.l.bf16 %v1304_v8 }
  0xab   :  { %v77_v13 = vsel %vm76_vm1, %v64_v9, %v1305_v12  ;;  %v78_v14 = vsel %vm76_vm1, %v65_v10, %v1306_v11 }
  0xac   :  { %v1286_v15 = vpack.c.bf16 %v78_v14, %v77_v13 }
  0xae   :  { %1287 = vmatprep.subr.bf16.mxu0 %v1286_v15 }
  0xaf   :  { %1289 = vmatpush3.bf16.msra.mxu0 %v1286_v15 }
  0xb2   :  { %1271 = vmatmul.mubr.msk.f32.vlgmr.msra.gmra.mrb[0].mxu0 %vm79_vm0, %v61_v16 }
  0xb3   :  { %1273 = vmatprep.mubr.msk.f32.mxu0 %vm79_vm0, %v62_v17 }
  0xb6   :  { %1274 = vmatmul.mubr.msk.f32.gmra.mrb[2].mxu0 %vm79_vm0, %v63_v18  ;;  %v1726_v50 = vpop.permute.xlu1 %687 }
  0xb9   :  { %v1721_v49 = vpop.permute.xlu0 %692 }
  0xbd   :  { %v1728_v51 = vpop.permute.xlu0 %697 }
  0xbe   :  { %2394 = vst [vmem:[#allocation17_spill] sm:$0xff] %v1728_v51 }
 0x185   :  { %v1272_v22 = vpop.f32.mrb[0].mxu0 }
 0x186   :  { %v158_v25 = vpop.f32.mrb[1].mxu0  ;;  %v404_v26 = vrot.slane %v1272_v22, %v251_v21  ;;  %v1696_v31 = vrot.slane %v1272_v22, %v365_v23  ;;  %v423_v32 = vrot.slane %v1272_v22, %v270_v27  ;;  %v1699_v35 = vrot.slane %v1272_v22, %v384_v24 }
 0x187   :  { %v1690_v28 = vrot.slane %v158_v25, %v365_v23  ;;  %v1692_v29 = vrot.slane %v158_v25, %v384_v24  ;;  %v442_v36 = vrot.slane %v1272_v22, %v289_v33  ;;  %v1702_v38 = vrot.slane %v1272_v22, %v308_v37 }
 0x188   :  { %410 = vbcast.lane.b32.xlu0 %v404_v26, 264  ;;  %406 = vbcast.lane.b32.xlu1 %v404_v26, 256  ;;  %v1707_v40 = vrot.slane %v1272_v22, %v327_v39  ;;  %v499_v42 = vrot.slane %v1272_v22, %v346_v41  ;;  %v252_v43 = vrot.slane %v158_v25, %v251_v21 }
 0x189   :  { %v1694_v30 = vpop.f32.mrb[2].mxu0  ;;  %v271_v44 = vrot.slane %v158_v25, %v270_v27  ;;  %v290_v45 = vrot.slane %v158_v25, %v289_v33  ;;  %v309_v46 = vrot.slane %v158_v25, %v308_v37  ;;  %v328_v47 = vrot.slane %v158_v25, %v327_v39 }
 0x18a   :  { %v168_v34 = vpop.f32.mrb[3].mxu0  ;;  %v347_v48 = vrot.slane %v158_v25, %v346_v41 }
 0x18c   :  { %429 = vbcast.lane.b32.xlu0 %v423_v32, 264  ;;  %425 = vbcast.lane.b32.xlu1 %v423_v32, 256 }
 0x190   :  { %448 = vbcast.lane.b32.xlu0 %v442_v36, 264  ;;  %444 = vbcast.lane.b32.xlu1 %v442_v36, 256 }
 0x194   :  { %433 = vbcast.lane.b32.xlu0 %v423_v32, 272  ;;  %414 = vbcast.lane.b32.xlu1 %v404_v26, 272 }
 0x198   :  { %467 = vbcast.lane.b32.xlu0 %v1702_v38, 264  ;;  %463 = vbcast.lane.b32.xlu1 %v1702_v38, 256 }
 0x19c   :  { %452 = vbcast.lane.b32.xlu0 %v442_v36, 272  ;;  %482 = vbcast.lane.b32.xlu1 %v1707_v40, 256 }
 0x1a0   :  { %486 = vbcast.lane.b32.xlu0 %v1707_v40, 264  ;;  %418 = vbcast.lane.b32.xlu1 %v404_v26, 280 }
 0x1a4   :  { %437 = vbcast.lane.b32.xlu0 %v423_v32, 280  ;;  %471 = vbcast.lane.b32.xlu1 %v1702_v38, 272 }
 0x1a8   :  { %501 = vbcast.lane.b32.xlu0 %v499_v42, 256  ;;  %505 = vbcast.lane.b32.xlu1 %v499_v42, 264 }
 0x1ac   :  { %456 = vbcast.lane.b32.xlu0 %v442_v36, 280  ;;  %490 = vbcast.lane.b32.xlu1 %v1707_v40, 272 }
 0x1b0   :  { %258 = vbcast.lane.b32.xlu0 %v252_v43, 264  ;;  %254 = vbcast.lane.b32.xlu1 %v252_v43, 256 }
 0x1b4   :  { %277 = vbcast.lane.b32.xlu0 %v271_v44, 264  ;;  %273 = vbcast.lane.b32.xlu1 %v271_v44, 256 }
 0x1b8   :  { %296 = vbcast.lane.b32.xlu0 %v290_v45, 264  ;;  %292 = vbcast.lane.b32.xlu1 %v290_v45, 256 }
 0x1bc   :  { %281 = vbcast.lane.b32.xlu0 %v271_v44, 272  ;;  %262 = vbcast.lane.b32.xlu1 %v252_v43, 272 }
 0x1c0   :  { %315 = vbcast.lane.b32.xlu0 %v309_v46, 264  ;;  %311 = vbcast.lane.b32.xlu1 %v309_v46, 256 }
 0x1c4   :  { %330 = vbcast.lane.b32.xlu0 %v328_v47, 256  ;;  %300 = vbcast.lane.b32.xlu1 %v290_v45, 272 }
 0x1c8   :  { %266 = vbcast.lane.b32.xlu0 %v252_v43, 280  ;;  %334 = vbcast.lane.b32.xlu1 %v328_v47, 264 }
 0x1cc   :  { %319 = vbcast.lane.b32.xlu0 %v309_v46, 272  ;;  %285 = vbcast.lane.b32.xlu1 %v271_v44, 280 }
 0x1d0   :  { %353 = vbcast.lane.b32.xlu0 %v347_v48, 264  ;;  %349 = vbcast.lane.b32.xlu1 %v347_v48, 256 }
 0x1d4   :  { %338 = vbcast.lane.b32.xlu0 %v328_v47, 272  ;;  %304 = vbcast.lane.b32.xlu1 %v290_v45, 280 }
 0x1d8   :  { %372 = vbcast.lane.b32.xlu0 %v1690_v28, 264  ;;  %368 = vbcast.lane.b32.xlu1 %v1690_v28, 256 }
 0x1dc   :  { %357 = vbcast.lane.b32.xlu0 %v347_v48, 272  ;;  %323 = vbcast.lane.b32.xlu1 %v309_v46, 280 }
 0x1e0   :  { %391 = vbcast.lane.b32.xlu0 %v1692_v29, 264  ;;  %387 = vbcast.lane.b32.xlu1 %v1692_v29, 256 }
 0x1e4   :  { %395 = vbcast.lane.b32.xlu0 %v1692_v29, 272  ;;  %342 = vbcast.lane.b32.xlu1 %v328_v47, 280 }
 0x1e8   :  { %376 = vbcast.lane.b32.xlu1 %v1690_v28, 272  ;;  %179 = vrot.lane.b32.xlu0 %v168_v34, %s1560_s1 }
 0x1ec   :  { %361 = vbcast.lane.b32.xlu1 %v347_v48, 280  ;;  %520 = vbcast.lane.b32.xlu0 %v1696_v31, 256 }
 0x1f0   :  { %380 = vbcast.lane.b32.xlu1 %v1690_v28, 280  ;;  %399 = vbcast.lane.b32.xlu0 %v1692_v29, 280 }
 0x1f4   :  { %181 = vrot.lane.b32.xlu1 %v1694_v30, %s1560_s1  ;;  %509 = vbcast.lane.b32.xlu0 %v499_v42, 272 }
 0x1f8   :  { %524 = vbcast.lane.b32.xlu1 %v1696_v31, 264  ;;  %543 = vbcast.lane.b32.xlu0 %v1699_v35, 264 }
 0x1fa   :  { %v1732_v52 = vpop.permute.xlu0 %410  ;;  %v1734_v53 = vpop.permute.xlu1 %406 }
 0x1fc   :  { %475 = vbcast.lane.b32.xlu1 %v1702_v38, 280  ;;  %494 = vbcast.lane.b32.xlu0 %v1707_v40, 280 }
 0x1fe   :  { %v1738_v54 = vpop.permute.xlu0 %429  ;;  %v1740_v55 = vpop.permute.xlu1 %425 }
 0x200   :  { %539 = vbcast.lane.b32.xlu1 %v1699_v35, 256  ;;  %513 = vbcast.lane.b32.xlu0 %v499_v42, 280 }
 0x202   :  { %v1746_v57 = vpop.permute.xlu0 %448  ;;  %v1748_v58 = vpop.permute.xlu1 %444 }
 0x204   :  { %702 = vperm.xlu1 %1307, %v684_v56   ;;  %532 = vbcast.lane.b32.xlu0 %v1696_v31, 280 }
 0x206   :  { %v1751_v59 = vpop.permute.xlu0 %433  ;;  %v1753_v60 = vpop.permute.xlu1 %414 }
 0x207   :  { %2395 = vst [vmem:[#allocation18_spill] sm:$0xff] %v1751_v59  ;;  %v2409_v59 = vlaneseq }
 0x208   :  { %528 = vbcast.lane.b32.xlu1 %v1696_v31, 272 }
 0x20a   :  { %v1756_v61 = vpop.permute.xlu0 %467  ;;  %v1758_v62 = vpop.permute.xlu1 %463 }
 0x20c   :  { %547 = vbcast.lane.b32.xlu1 %v1699_v35, 272 }
 0x20e   :  { %v1761_v63 = vpop.permute.xlu0 %452  ;;  %v1763_v0 = vpop.permute.xlu1 %482 }
 0x20f   :  { %2396 = vst [vmem:[#allocation19_spill] sm:$0xff] %v1761_v63 }
 0x210   :  { %551 = vbcast.lane.b32.xlu1 %v1699_v35, 280 }
 0x212   :  { %v1766_v1 = vpop.permute.xlu0 %486  ;;  %v1768_v2 = vpop.permute.xlu1 %418 }
 0x213   :  { %2397 = vst [vmem:[#allocation20_spill] sm:$0xff] %v1768_v2 }
 0x216   :  { %v1770_v3 = vpop.permute.xlu0 %437  ;;  %v1772_v4 = vpop.permute.xlu1 %471 }
 0x217   :  { %2398 = vst [vmem:[#allocation21_spill] sm:$0xff] %v1770_v3  ;;  %2399 = vst [vmem:[#allocation22_spill] sm:$0xff] %v1772_v4 }
 0x21a   :  { %v1774_v5 = vpop.permute.xlu0 %501  ;;  %v1776_v6 = vpop.permute.xlu1 %505 }
 0x21e   :  { %v1778_v7 = vpop.permute.xlu0 %456  ;;  %v1780_v8 = vpop.permute.xlu1 %490 }
 0x21f   :  { %2400 = vst [vmem:[#allocation23_spill] sm:$0xff] %v1778_v7  ;;  %2401 = vst [vmem:[#allocation24_spill] sm:$0xff] %v1780_v8 }
 0x222   :  { %v1782_v9 = vpop.permute.xlu0 %258  ;;  %v255_v10 = vpop.permute.xlu1 %254 }
 0x226   :  { %v1784_v11 = vpop.permute.xlu0 %277  ;;  %v274_v12 = vpop.permute.xlu1 %273 }
 0x22a   :  { %v1786_v13 = vpop.permute.xlu0 %296  ;;  %v293_v14 = vpop.permute.xlu1 %292 }
 0x22e   :  { %v1788_v15 = vpop.permute.xlu0 %281  ;;  %v1790_v16 = vpop.permute.xlu1 %262 }
 0x232   :  { %v1792_v17 = vpop.permute.xlu0 %315  ;;  %v312_v18 = vpop.permute.xlu1 %311 }
 0x236   :  { %v331_v20 = vpop.permute.xlu0 %330  ;;  %v1794_v21 = vpop.permute.xlu1 %300 }
 0x23a   :  { %v1796_v22 = vpop.permute.xlu0 %266  ;;  %v335_v23 = vpop.permute.xlu1 %334 }
 0x23e   :  { %v1798_v24 = vpop.permute.xlu0 %319  ;;  %v1800_v25 = vpop.permute.xlu1 %285 }
 0x242   :  { %v354_v26 = vpop.permute.xlu0 %353  ;;  %v350_v27 = vpop.permute.xlu1 %349 }
 0x246   :  { %v1802_v28 = vpop.permute.xlu0 %338  ;;  %v1804_v29 = vpop.permute.xlu1 %304 }
 0x24a   :  { %v373_v30 = vpop.permute.xlu0 %372  ;;  %v369_v31 = vpop.permute.xlu1 %368 }
 0x24e   :  { %v1806_v32 = vpop.permute.xlu0 %357  ;;  %v1808_v33 = vpop.permute.xlu1 %323 }
 0x252   :  { %v392_v34 = vpop.permute.xlu0 %391  ;;  %v388_v35 = vpop.permute.xlu1 %387 }
 0x256   :  { %v396_v36 = vpop.permute.xlu0 %395  ;;  %v1810_v37 = vpop.permute.xlu1 %342 }
 0x25a   :  { %v377_v38 = vpop.permute.xlu1 %376  ;;  %v180_v39 = vpop.permute.xlu0 %179 }
 0x25b   :  { %185 = vxpose.xlu0.b32.start.end [1/1] (short) (narrow) %v180_v39, 32 }
 0x25e   :  { %v1812_v40 = vpop.permute.xlu1 %361  ;;  %v1816_v43 = vpop.permute.xlu0 %520 }
 0x262   :  { %v1814_v41 = vpop.permute.xlu1 %380  ;;  %v1818_v44 = vpop.permute.xlu0 %399 }
 0x266   :  { %v182_v42 = vpop.permute.xlu1 %181  ;;  %v1820_v45 = vpop.permute.xlu0 %509 }
 0x267   :  { %217 = vxpose.xlu1.b32.start.end [1/1] (short) (narrow) %v182_v42, 32  ;;  %2402 = vst [vmem:[#allocation25_spill] sm:$0xff] %v1820_v45 }
 0x26a   :  { %v1822_v46 = vpop.permute.xlu1 %524  ;;  %v1824_v47 = vpop.permute.xlu0 %543 }
 0x26e   :  { %v1826_v48 = vpop.permute.xlu1 %475  ;;  %v1828_v56 = vpop.permute.xlu0 %494 }
 0x26f   :  { %2403 = vst [vmem:[#allocation26_spill] sm:$0xff] %v1826_v48  ;;  %2404 = vst [vmem:[#allocation27_spill] sm:$0xff] %v1828_v56 }
 0x272   :  { %v1830_v39 = vpop.permute.xlu1 %539  ;;  %v1832_v19 = vpop.permute.xlu0 %513 }
 0x273   :  { %2405 = vst [vmem:[#allocation28_spill] sm:$0xff] %v1832_v19 }
 0x276   :  { %v1836_v42 = vpop.permute.xlu0 %532 }
 0x277   :  { %2407 = vst [vmem:[#allocation30_spill] sm:$0xff] %v1836_v42 }
 0x283   :  { %v1834_v51 = vpop.permute.xlu1 %702 }
 0x284   :  { %2406 = vst [vmem:[#allocation29_spill] sm:$0xff] %v1834_v51 }
 0x287   :  { %v1838_v7 = vpop.permute.xlu1 %528 }
 0x288   :  { %2408 = vst [vmem:[#allocation31_spill] sm:$0xff] %v1838_v7 }
 0x28b   :  { %v1842_v48 = vpop.permute.xlu1 %547 }
 0x2db   :  { %v201_v3 = vpop.trf.xlu0 }
 0x2dc   :  { %v553_v2 = vadd.f32 %v255_v10, %v201_v3  ;;  %v557_v45 = vadd.f32 %v274_v12, %v201_v3  ;;  %v561_v8 = vadd.f32 %v293_v14, %v201_v3  ;;  %v565_v56 = vadd.f32 %v312_v18, %v201_v3  ;;  %v1849_v14 = vpop.permute.xlu1 %551  ;;  %v2422_v12 = vld [vmem:[#allocation28_spill] sm:$0xff] }
 0x2dd   :  { %v569_v4 = vadd.f32 %v331_v20, %v201_v3  ;;  %v573_v63 = vadd.f32 %v350_v27, %v201_v3  ;;  %v577_v51 = vadd.f32 %v369_v31, %v201_v3  ;;  %v581_v42 = vadd.f32 %v388_v35, %v201_v3 }
 0x2de   :  { %1309 = vtanh.f32 %v553_v2  ;;  %v1846_v10 = vand.u32 127, %v2409_v59 }
 0x2df   :  { %1311 = vtanh.f32 %v557_v45  ;;  %v202_v19 = vpop.trf.xlu0 }
 0x2e0   :  { %1313 = vtanh.f32 %v561_v8  ;;  %v554_v7 = vadd.f32 %v1782_v9, %v202_v19  ;;  %2410 = vst [vmem:[#allocation32_spill] sm:$0xff] %v1846_v10  ;;  %v558_v18 = vadd.f32 %v1784_v11, %v202_v19  ;;  %v562_v2 = vadd.f32 %v1786_v13, %v202_v19 }
 0x2e1   :  { %1315 = vtanh.f32 %v565_v56  ;;  %v566_v20 = vadd.f32 %v1792_v17, %v202_v19  ;;  %v570_v3 = vadd.f32 %v335_v23, %v202_v19  ;;  %v574_v8 = vadd.f32 %v354_v26, %v202_v19 }
 0x2e2   :  { %1317 = vtanh.f32 %v569_v4  ;;  %v578_v4 = vadd.f32 %v373_v30, %v202_v19  ;;  %v582_v9 = vadd.f32 %v392_v34, %v202_v19 }
 0x2e3   :  { %1319 = vtanh.f32 %v573_v63  ;;  %v203_v27 = vpop.trf.xlu0 }
 0x2e4   :  { %1321 = vtanh.f32 %v577_v51  ;;  %v555_v59 = vadd.f32 %v1790_v16, %v203_v27  ;;  %v559_v31 = vadd.f32 %v1788_v15, %v203_v27  ;;  %v563_v63 = vadd.f32 %v1794_v21, %v203_v27 }
 0x2e5   :  { %1323 = vtanh.f32 %v581_v42  ;;  %v567_v11 = vadd.f32 %v1798_v24, %v203_v27  ;;  %v571_v13 = vadd.f32 %v1802_v28, %v203_v27  ;;  %v1860_v17 = vadd.f32 %v1806_v32, %v203_v27 }
 0x2e6   :  { %1325 = vtanh.f32 %v554_v7  ;;  %v1862_v51 = vadd.f32 %v377_v38, %v203_v27  ;;  %v1864_v23 = vadd.f32 %v396_v36, %v203_v27 }
 0x2e7   :  { %1327 = vtanh.f32 %v558_v18  ;;  %v233_v19 = vpop.trf.xlu1  ;;  %v204_v21 = vpop.trf.xlu0 }
 0x2e8   :  { %v1310_v26 = vpop.eup %1309  ;;  %1329 = vtanh.f32 %v562_v2  ;;  %v1867_v15 = vadd.f32 %v1734_v53, %v233_v19  ;;  %v1870_v7 = vadd.f32 %v1740_v55, %v233_v19  ;;  %v1873_v16 = vadd.f32 %v1748_v58, %v233_v19 }
 0x2e9   :  { %v1312_v24 = vpop.eup %1311  ;;  %v1876_v28 = vmul.f32 %v1310_v26, %v1726_v50  ;;  %1331 = vtanh.f32 %v566_v20  ;;  %v1879_v30 = vadd.f32 %v1758_v62, %v233_v19  ;;  %v1882_v32 = vadd.f32 %v1763_v0, %v233_v19  ;;  %v2416_v26 = vld [vmem:[#allocation31_spill] sm:$0xff] }
 0x2ea   :  { %v1884_v53 = vpop.eup %1313  ;;  %v1887_v55 = vmul.f32 %v1312_v24, %v1726_v50  ;;  %1333 = vtanh.f32 %v570_v3  ;;  %v1890_v58 = vadd.f32 %v1774_v5, %v233_v19  ;;  %v1893_v34 = vadd.f32 %v1816_v43, %v233_v19  ;;  %v2411_v3 = vld [vmem:[#allocation18_spill] sm:$0xff] }
 0x2eb   :  { %v1895_v35 = vpop.eup %1315  ;;  %1335 = vtanh.f32 %v574_v8  ;;  %v1898_v62 = vadd.f32 %v1830_v39, %v233_v19  ;;  %v1901_v0 = vadd.f32 %v1796_v22, %v204_v21  ;;  %v1904_v36 = vadd.f32 %v1800_v25, %v204_v21  ;;  %v234_v38 = vpop.trf.xlu1  ;;  %v2412_v8 = vld [vmem:[#allocation19_spill] sm:$0xff] }
 0x2ec   :  { %v1906_v45 = vpop.eup %1317  ;;  %1337 = vtanh.f32 %v578_v4  ;;  %v1909_v5 = vadd.f32 %v1804_v29, %v204_v21  ;;  %v1912_v43 = vadd.f32 %v1808_v33, %v204_v21  ;;  %v1915_v56 = vadd.f32 %v1810_v37, %v204_v21 }
 0x2ed   :  { %v1320_v39 = vpop.eup %1319  ;;  %1339 = vtanh.f32 %v582_v9  ;;  %v1918_v22 = vadd.f32 %v1812_v40, %v204_v21  ;;  %v1921_v25 = vadd.f32 %v1814_v41, %v204_v21  ;;  %v1924_v42 = vadd.f32 %v1818_v44, %v204_v21 }
 0x2ee   :  { %v1322_v18 = vpop.eup %1321  ;;  %1341 = vtanh.f32 %v555_v59  ;;  %v1927_v29 = vadd.f32 %v1732_v52, %v234_v38  ;;  %v1930_v33 = vadd.f32 %v1738_v54, %v234_v38  ;;  %v1933_v37 = vadd.f32 %v1746_v57, %v234_v38 }
 0x2ef   :  { %v1324_v2 = vpop.eup %1323  ;;  %1343 = vtanh.f32 %v559_v31  ;;  %v1936_v40 = vadd.f32 %v1756_v61, %v234_v38  ;;  %v1939_v41 = vadd.f32 %v1766_v1, %v234_v38  ;;  %v1942_v44 = vadd.f32 %v1776_v6, %v234_v38  ;;  %v235_v20 = vpop.trf.xlu1 }
 0x2f0   :  { %v1326_v52 = vpop.eup %1325  ;;  %1345 = vtanh.f32 %v563_v63  ;;  %v1945_v54 = vadd.f32 %v1822_v46, %v234_v38  ;;  %v1948_v57 = vadd.f32 %v1824_v47, %v234_v38  ;;  %v1951_v27 = vadd.f32 %v1753_v60, %v235_v20  ;;  %v2413_v47 = vld [vmem:[#allocation22_spill] sm:$0xff]  ;;  %v2414_v60 = vld [vmem:[#allocation24_spill] sm:$0xff] }
 0x2f1   :  { %v1328_v61 = vpop.eup %1327  ;;  %v706_v1 = vmul.f32 %v1326_v52, %v1721_v49  ;;  %1347 = vtanh.f32 %v567_v11  ;;  %v1955_v6 = vadd.f32 %v2411_v3, %v235_v20  ;;  %v1958_v4 = vadd.f32 %v2412_v8, %v235_v20  ;;  %v2415_v11 = vld [vmem:[#allocation25_spill] sm:$0xff]  ;;  %v2417_v52 = vld [vmem:[#allocation20_spill] sm:$0xff] }
 0x2f2   :  { %v1330_v9 = vpop.eup %1329  ;;  %v1961_v46 = vmul.f32 %v1328_v61, %v1721_v49  ;;  %1349 = vtanh.f32 %v571_v13  ;;  %v1964_v59 = vadd.f32 %v2413_v47, %v235_v20  ;;  %v1967_v31 = vadd.f32 %v2414_v60, %v235_v20  ;;  %v2418_v3 = vld [vmem:[#allocation21_spill] sm:$0xff] }
 0x2f3   :  { %v1332_v63 = vpop.eup %1331  ;;  %1351 = vtanh.f32 %v1860_v17  ;;  %v1971_v19 = vadd.f32 %v2415_v11, %v235_v20  ;;  %v1974_v21 = vadd.f32 %v2416_v26, %v235_v20  ;;  %v1977_v24 = vadd.f32 %v1842_v48, %v235_v20  ;;  %v236_v38 = vpop.trf.xlu1  ;;  %v2419_v17 = vld [vmem:[#allocation23_spill] sm:$0xff]  ;;  %v2420_v11 = vld [vmem:[#allocation26_spill] sm:$0xff] }
 0x2f4   :  { %v1334_v13 = vpop.eup %1333  ;;  %1353 = vtanh.f32 %v1862_v51  ;;  %v1981_v61 = vadd.f32 %v2417_v52, %v236_v38  ;;  %v1984_v8 = vadd.f32 %v2418_v3, %v236_v38  ;;  %v1987_v47 = vadd.f32 %v2419_v17, %v236_v38  ;;  %v2421_v48 = vld [vmem:[#allocation27_spill] sm:$0xff]  ;;  %v2424_v3 = vld [vmem:[#allocation30_spill] sm:$0xff] }
 0x2f5   :  { %v1336_v60 = vpop.eup %1335  ;;  %1355 = vtanh.f32 %v1864_v23  ;;  %v1991_v26 = vadd.f32 %v2420_v11, %v236_v38  ;;  %v1994_v20 = vadd.f32 %v2421_v48, %v236_v38  ;;  %v1997_v51 = vadd.f32 %v2422_v12, %v236_v38 }
 0x2f6   :  { %v1338_v52 = vpop.eup %1337  ;;  %1357 = vtanh.f32 %v1867_v15  ;;  %v2001_v10 = vadd.f32 %v2424_v3, %v236_v38  ;;  %v2004_v17 = vadd.f32 %v1849_v14, %v236_v38  ;;  %v713_v23 = vmul.f32 %v1884_v53, %v1726_v50 }
 0x2f7   :  { %2423 = vst [vmem:[#allocation18_spill] sm:$0xff] %v1997_v51  ;;  %v1340_v11 = vpop.eup %1339  ;;  %1359 = vtanh.f32 %v1870_v7  ;;  %v714_v48 = vmul.f32 %v1330_v9, %v1721_v49  ;;  %v717_v12 = vmul.f32 %v1895_v35, %v1726_v50  ;;  %v718_v51 = vmul.f32 %v1332_v63, %v1721_v49  ;;  %v2427_v7 = vld [vmem:[#allocation17_spill] sm:$0xff] }
 0x2f8   :  { %2425 = vst [vmem:[#allocation19_spill] sm:$0xff] %v2001_v10  ;;  %2426 = vst [vmem:[#allocation22_spill] sm:$0xff] %v2004_v17  ;;  %v1342_v15 = vpop.eup %1341  ;;  %1361 = vtanh.f32 %v1873_v16  ;;  %v721_v14 = vmul.f32 %v1906_v45, %v1726_v50  ;;  %v722_v38 = vmul.f32 %v1334_v13, %v1721_v49  ;;  %v2018_v53 = vmul.f32 %v1320_v39, %v1726_v50 }
 0x2f9   :  { %v1344_v3 = vpop.eup %1343  ;;  %v707_v17 = vmul.f32 %v1342_v15, %v2427_v7  ;;  %1363 = vtanh.f32 %v1879_v30  ;;  %v2023_v35 = vmul.f32 %v1336_v60, %v1721_v49  ;;  %v2026_v9 = vmul.f32 %v1322_v18, %v1726_v50 }
 0x2fa   :  { %v1346_v16 = vpop.eup %1345  ;;  %v711_v63 = vmul.f32 %v1344_v3, %v2427_v7  ;;  %1365 = vtanh.f32 %v1882_v32  ;;  %v2031_v45 = vmul.f32 %v1338_v52, %v1721_v49  ;;  %v2034_v39 = vmul.f32 %v1324_v2, %v1726_v50 }
 0x2fb   :  { %v1348_v13 = vpop.eup %1347  ;;  %1367 = vtanh.f32 %v1890_v58  ;;  %v715_v30 = vmul.f32 %v1346_v16, %v2427_v7  ;;  %v2039_v60 = vmul.f32 %v1340_v11, %v1721_v49  ;;  %v770_v18 = vsel %vm769_vm2, %v1876_v28, 0.0 }
 0x2fc   :  { %v1350_v15 = vpop.eup %1349  ;;  %1369 = vtanh.f32 %v1893_v34  ;;  %v719_v32 = vmul.f32 %v1348_v13, %v2427_v7  ;;  %v771_v52 = vsel %vm769_vm2, %v706_v1, 0.0  ;;  %v773_v2 = vsel %vm769_vm2, %v707_v17, 0.0 }
 0x2fd   :  { %v1352_v3 = vpop.eup %1351  ;;  %1371 = vtanh.f32 %v1898_v62  ;;  %v723_v58 = vmul.f32 %v1350_v15, %v2427_v7  ;;  %v772_v16 = vadd.f32 %v771_v52, %v770_v18  ;;  %v783_v11 = vsel %vm769_vm2, %v1887_v55, 0.0 }
 0x2fe   :  { %v1354_v10 = vpop.eup %1353  ;;  %1373 = vtanh.f32 %v1901_v0  ;;  %v727_v28 = vmul.f32 %v1352_v3, %v2427_v7  ;;  %v784_v34 = vsel %vm769_vm2, %v1961_v46, 0.0  ;;  %v786_v1 = vsel %vm769_vm2, %v711_v63, 0.0 }
 0x2ff   :  { %v1356_v17 = vpop.eup %1355  ;;  %1375 = vtanh.f32 %v1904_v36  ;;  %v731_v62 = vmul.f32 %v1354_v10, %v2427_v7  ;;  %v2058_v13 = vadd.f32 %v773_v2, %v772_v16  ;;  %v785_v18 = vadd.f32 %v784_v34, %v783_v11 }
 0x300   :  { %v1358_v15 = vpop.eup %1357  ;;  %1377 = vtanh.f32 %v1909_v5  ;;  %v735_v55 = vmul.f32 %v1356_v17, %v2427_v7  ;;  %v796_v0 = vsel %vm769_vm2, %v713_v23, 0.0  ;;  %v797_v52 = vsel %vm769_vm2, %v714_v48, 0.0 }
 0x301   :  { %v1360_v46 = vpop.eup %1359  ;;  %v2065_v63 = vmul.f32 %v1358_v15, %v1726_v50  ;;  %1379 = vtanh.f32 %v1912_v43  ;;  %v787_v36 = vadd.f32 %v786_v1, %v785_v18  ;;  %v798_v10 = vadd.f32 %v797_v52, %v796_v0 }
 0x302   :  { %v2068_v2 = vpop.eup %1361  ;;  %v2071_v3 = vmul.f32 %v1360_v46, %v1726_v50  ;;  %1381 = vtanh.f32 %v1915_v56  ;;  %v799_v5 = vsel %vm769_vm2, %v715_v30, 0.0  ;;  %v809_v23 = vsel %vm769_vm2, %v717_v12, 0.0 }
 0x303   :  { %v2076_v48 = vpop.eup %1363  ;;  %1383 = vtanh.f32 %v1918_v22  ;;  %v800_v16 = vadd.f32 %v799_v5, %v798_v10  ;;  %v810_v43 = vsel %vm769_vm2, %v718_v51, 0.0  ;;  %v812_v11 = vsel %vm769_vm2, %v719_v32, 0.0 }
 0x304   :  { %v2081_v34 = vpop.eup %1365  ;;  %1385 = vtanh.f32 %v1921_v25  ;;  %v811_v1 = vadd.f32 %v810_v43, %v809_v23  ;;  %v822_v56 = vsel %vm769_vm2, %v721_v14, 0.0  ;;  %v823_v30 = vsel %vm769_vm2, %v722_v38, 0.0 }
 0x305   :  { %v2086_v17 = vpop.eup %1367  ;;  %1387 = vtanh.f32 %v1924_v42  ;;  %v824_v12 = vadd.f32 %v823_v30, %v822_v56  ;;  %v825_v22 = vsel %vm769_vm2, %v723_v58, 0.0  ;;  %v835_v51 = vsel %vm769_vm2, %v2018_v53, 0.0 }
 0x306   :  { %v2092_v32 = vpop.eup %1369  ;;  %1389 = vtanh.f32 %v1927_v29  ;;  %v813_v25 = vadd.f32 %v812_v11, %v811_v1  ;;  %v836_v14 = vsel %vm769_vm2, %v2023_v35, 0.0  ;;  %v838_v38 = vsel %vm769_vm2, %v727_v28, 0.0 }
 0x307   :  { %v2098_v18 = vpop.eup %1371  ;;  %1391 = vtanh.f32 %v1930_v33  ;;  %v2101_v42 = vadd.f32 %v825_v22, %v824_v12  ;;  %v837_v58 = vadd.f32 %v836_v14, %v835_v51  ;;  %v848_v53 = vsel %vm769_vm2, %v2026_v9, 0.0  ;;  %v2428_v33 = vld [vmem:[#allocation29_spill] sm:$0xff] }
 0x308   :  { %v1374_v15 = vpop.eup %1373  ;;  %1393 = vtanh.f32 %v1933_v37  ;;  %v849_v29 = vsel %vm769_vm2, %v2031_v45, 0.0  ;;  %v851_v35 = vsel %vm769_vm2, %v731_v62, 0.0  ;;  %v2111_v28 = vsel %vm769_vm2, %v2034_v39, 0.0 }
 0x309   :  { %v1376_v0 = vpop.eup %1375  ;;  %1395 = vtanh.f32 %v1936_v40  ;;  %v708_v52 = vmul.f32 %v1374_v15, %v2428_v33  ;;  %v2115_v46 = vadd.f32 %v838_v38, %v837_v58  ;;  %v850_v9 = vadd.f32 %v849_v29, %v848_v53 }
 0x30a   :  { %v1378_v10 = vpop.eup %1377  ;;  %1397 = vtanh.f32 %v1939_v41  ;;  %v712_v37 = vmul.f32 %v1376_v0, %v2428_v33  ;;  %v2121_v45 = vsel %vm769_vm2, %v2039_v60, 0.0  ;;  %v2124_v39 = vsel %vm769_vm2, %v735_v55, 0.0 }
 0x30b   :  { %v1380_v62 = vpop.eup %1379  ;;  %1399 = vtanh.f32 %v1942_v44  ;;  %v716_v40 = vmul.f32 %v1378_v10, %v2428_v33  ;;  %v775_v5 = vsel %vm769_vm2, %v708_v52, 0.0  ;;  %v2129_v23 = vadd.f32 %v851_v35, %v850_v9 }
 0x30c   :  { %v1382_v43 = vpop.eup %1381  ;;  %1401 = vtanh.f32 %v1945_v54  ;;  %v720_v41 = vmul.f32 %v1380_v62, %v2428_v33  ;;  %v776_v60 = vadd.f32 %v775_v5, %v2058_v13  ;;  %v788_v11 = vsel %vm769_vm2, %v712_v37, 0.0 }
 0x30d   :  { %v1384_v55 = vpop.eup %1383  ;;  %1403 = vtanh.f32 %v1948_v57  ;;  %v724_v44 = vmul.f32 %v1382_v43, %v2428_v33  ;;  %v789_v1 = vadd.f32 %v788_v11, %v787_v36  ;;  %v801_v56 = vsel %vm769_vm2, %v716_v40, 0.0 }
 0x30e   :  { %v1386_v30 = vpop.eup %1385  ;;  %1405 = vtanh.f32 %v1951_v27  ;;  %v728_v12 = vmul.f32 %v1384_v55, %v2428_v33  ;;  %v777_v54 = vrot.slane %v776_v60, 4  ;;  %v802_v22 = vadd.f32 %v801_v56, %v800_v16 }
 0x30f   :  { %v1388_v51 = vpop.eup %1387  ;;  %1407 = vtanh.f32 %v1955_v6  ;;  %v2142_v13 = vmul.f32 %v1386_v30, %v2428_v33  ;;  %v790_v14 = vrot.slane %v789_v1, 4  ;;  %v814_v57 = vsel %vm769_vm2, %v720_v41, 0.0 }
 0x310   :  { %v1390_v38 = vpop.eup %1389  ;;  %1409 = vtanh.f32 %v1958_v4  ;;  %v2147_v36 = vmul.f32 %v1388_v51, %v2428_v33  ;;  %v778_v27 = vadd.f32 %v777_v54, %v776_v60  ;;  %v803_v58 = vrot.slane %v802_v22, 4 }
 0x311   :  { %v1392_v53 = vpop.eup %1391  ;;  %v2150_v16 = vmul.f32 %v1390_v38, %v1721_v49  ;;  %1411 = vtanh.f32 %v1964_v59  ;;  %v791_v6 = vadd.f32 %v790_v14, %v789_v1  ;;  %v815_v15 = vadd.f32 %v814_v57, %v813_v25  ;;  %v2429_v38 = vld [vmem:[#allocation18_spill] sm:$0xff] }
 0x312   :  { %v2153_v29 = vpop.eup %1393  ;;  %v2156_v35 = vmul.f32 %v1392_v53, %v1721_v49  ;;  %1413 = vtanh.f32 %v1967_v31  ;;  %v779_v4 = vrot.slane %v778_v27, 2  ;;  %v804_v0 = vadd.f32 %v803_v58, %v802_v22 }
 0x313   :  { %v2159_v52 = vpop.eup %1395  ;;  %1415 = vtanh.f32 %v1971_v19  ;;  %v792_v9 = vrot.slane %v791_v6, 2  ;;  %v816_v10 = vrot.slane %v815_v15, 4  ;;  %v827_v37 = vsel %vm769_vm2, %v724_v44, 0.0 }
 0x314   :  { %v2163_v59 = vpop.eup %1397  ;;  %1417 = vtanh.f32 %v1974_v21  ;;  %v780_v25 = vadd.f32 %v779_v4, %v778_v27  ;;  %v805_v62 = vrot.slane %v804_v0, 2  ;;  %v828_v40 = vadd.f32 %v827_v37, %v2101_v42 }
 0x315   :  { %v2167_v31 = vpop.eup %1399  ;;  %1419 = vtanh.f32 %v1977_v24  ;;  %v793_v5 = vadd.f32 %v792_v9, %v791_v6  ;;  %v817_v19 = vadd.f32 %v816_v10, %v815_v15  ;;  %v840_v43 = vsel %vm769_vm2, %v728_v12, 0.0  ;;  %v2431_v9 = vld [vmem:[#allocation22_spill] sm:$0xff] }
 0x316   :  { %v2171_v41 = vpop.eup %1401  ;;  %1421 = vtanh.f32 %v1981_v61  ;;  %v781_v60 = vrot.slane %v780_v25, 1  ;;  %v806_v21 = vadd.f32 %v805_v62, %v804_v0  ;;  %v829_v11 = vrot.slane %v828_v40, 4 }
 0x317   :  { %v2174_v55 = vpop.eup %1403  ;;  %1423 = vtanh.f32 %v1984_v8  ;;  %v794_v42 = vrot.slane %v793_v5, 1  ;;  %v818_v44 = vrot.slane %v817_v19, 2  ;;  %v841_v24 = vadd.f32 %v840_v43, %v2115_v46 }
 0x318   :  { %v1406_v1 = vpop.eup %1405  ;;  %1425 = vtanh.f32 %v1987_v47  ;;  %v782_v56 = vadd.f32 %v781_v60, %v780_v25  ;;  %v807_v30 = vrot.slane %v806_v21, 1  ;;  %v830_v12 = vadd.f32 %v829_v11, %v828_v40 }
 0x319   :  { %v1408_v54 = vpop.eup %1407  ;;  %v2180_v61 = vmul.f32 %v1406_v1, %v2427_v7  ;;  %1427 = vtanh.f32 %v1991_v26  ;;  %v795_v22 = vadd.f32 %v794_v42, %v793_v5  ;;  %v819_v51 = vadd.f32 %v818_v44, %v817_v19  ;;  %v2430_v26 = vld [vmem:[#allocation19_spill] sm:$0xff] }
 0x31a   :  { %v1410_v8 = vpop.eup %1409  ;;  %v2184_v14 = vmul.f32 %v1408_v54, %v2427_v7  ;;  %1429 = vtanh.f32 %v1994_v20  ;;  %v808_v46 = vadd.f32 %v807_v30, %v806_v21  ;;  %v831_v57 = vrot.slane %v830_v12, 2 }
 0x31b   :  { %v1412_v47 = vpop.eup %1411  ;;  %1431 = vtanh.f32 %v2429_v38  ;;  %v820_v27 = vrot.slane %v819_v51, 1  ;;  %v842_v58 = vrot.slane %v841_v24, 4  ;;  %v853_v53 = vsel %vm769_vm2, %v2142_v13, 0.0 }
 0x31c   :  { %v1414_v6 = vpop.eup %1413  ;;  %1433 = vtanh.f32 %v2430_v26  ;;  %v832_v15 = vadd.f32 %v831_v57, %v830_v12  ;;  %v854_v4 = vadd.f32 %v853_v53, %v2129_v23  ;;  %v863_v0 = vadd.f32 %v2121_v45, %v2111_v28  ;;  %v2433_v26 = vld [vmem:[#allocation32_spill] sm:$0xff] }
 0x31d   :  { %v1416_v20 = vpop.eup %1415  ;;  %1435 = vtanh.f32 %v2431_v9  ;;  %v821_v10 = vadd.f32 %v820_v27, %v819_v51  ;;  %v843_v37 = vadd.f32 %v842_v58, %v841_v24  ;;  %v866_v25 = vsel %vm769_vm2, %v2147_v36, 0.0 }
 0x31e   :  { %v1418_v62 = vpop.eup %1417  ;;  %v833_v13 = vrot.slane %v832_v15, 1  ;;  %v855_v40 = vrot.slane %v854_v4, 4  ;;  %v865_v5 = vadd.f32 %v2124_v39, %v863_v0  ;;  %v1003_v19 = vsel %vm1002_vm3, %v795_v22, %v782_v56 }
 0x31f   :  { %v1420_v23 = vpop.eup %1419  ;;  %v844_v43 = vrot.slane %v843_v37, 2  ;;  %v1005_v28 = vsel %vm1004_vm4, %v808_v46, %v1003_v19  ;;  %v2202_v45 = vmul.f32 %v2068_v2, %v1726_v50  ;;  %v2206_v60 = vmul.f32 %v2153_v29, %v1721_v49 }
 0x320   :  { %v1422_v36 = vpop.eup %1421  ;;  %v834_v21 = vadd.f32 %v833_v13, %v832_v15  ;;  %v856_v11 = vadd.f32 %v855_v40, %v854_v4  ;;  %v867_v42 = vadd.f32 %v866_v25, %v865_v5  ;;  %v1007_v39 = vsel %vm1006_vm5, %v821_v10, %v1005_v28 }
 0x321   :  { %v1424_v44 = vpop.eup %1423  ;;  %v845_v24 = vadd.f32 %v844_v43, %v843_v37  ;;  %v740_v1 = vmul.f32 %v1422_v36, %v2428_v33  ;;  %v747_v56 = vmul.f32 %v1410_v8, %v2427_v7  ;;  %v2213_v2 = vmul.f32 %v2076_v48, %v1726_v50 }
 0x322   :  { %v1426_v30 = vpop.eup %1425  ;;  %v857_v29 = vrot.slane %v856_v11, 2  ;;  %v868_v12 = vrot.slane %v867_v42, 4  ;;  %v1009_v54 = vsel %vm1008_vm6, %v834_v21, %v1007_v39  ;;  %v744_v22 = vmul.f32 %v1424_v44, %v2428_v33 }
 0x323   :  { %v1428_v51 = vpop.eup %1427  ;;  %v846_v46 = vrot.slane %v845_v24, 1  ;;  %v748_v57 = vmul.f32 %v1426_v30, %v2428_v33  ;;  %v750_v8 = vmul.f32 %v2159_v52, %v1721_v49  ;;  %v751_v38 = vmul.f32 %v1412_v47, %v2427_v7 }
 0x324   :  { %v1430_v27 = vpop.eup %1429  ;;  %v858_v48 = vadd.f32 %v857_v29, %v856_v11  ;;  %v869_v58 = vadd.f32 %v868_v12, %v867_v42  ;;  %v2432_v53 = vstv %s1840_s6  ;;  %v752_v4 = vmul.f32 %v1428_v51, %v2428_v33 }
 0x325   :  { %vm2224_vm10 = vcmp.lt.s32.totalorder %v2433_v26, %v2432_v53  ;;  %v753_v0 = vmul.f32 %v2081_v34, %v1726_v50  ;;  %v1432_v9 = vpop.eup %1431  ;;  %v847_v10 = vadd.f32 %v846_v46, %v845_v24  ;;  %v754_v52 = vmul.f32 %v2163_v59, %v1721_v49 }
 0x326   :  { %v755_v47 = vmul.f32 %v1414_v6, %v2427_v7  ;;  %v756_v37 = vmul.f32 %v1430_v27, %v2428_v33  ;;  %v1434_v25 = vpop.eup %1433  ;;  %v859_v13 = vrot.slane %v858_v48, 1  ;;  %v870_v40 = vrot.slane %v869_v58, 2 }
 0x327   :  { %v757_v5 = vmul.f32 %v2086_v17, %v1726_v50  ;;  %v758_v19 = vmul.f32 %v2167_v31, %v1721_v49  ;;  %v1436_v43 = vpop.eup %1435  ;;  %v1011_v34 = vsel %vm1010_vm7, %v847_v10, %v1009_v54  ;;  %v2241_v28 = vmul.f32 %v1416_v20, %v2427_v7 }
 0x328   :  { %v2244_v59 = vmul.f32 %v1432_v9, %v2428_v33  ;;  %v2248_v6 = vmul.f32 %v2092_v32, %v1726_v50  ;;  %v860_v36 = vadd.f32 %v859_v13, %v858_v48  ;;  %v871_v21 = vadd.f32 %v870_v40, %v869_v58 }
 0x329   :  { %v2252_v17 = vmul.f32 %v2171_v41, %v1721_v49  ;;  %v2255_v31 = vmul.f32 %v1418_v62, %v2427_v7  ;;  %v2258_v11 = vmul.f32 %v1434_v25, %v2428_v33  ;;  %v2262_v20 = vmul.f32 %v2098_v18, %v1726_v50 }
 0x32a   :  { %v2266_v32 = vmul.f32 %v2174_v55, %v1721_v49  ;;  %v2269_v42 = vmul.f32 %v1420_v23, %v2427_v7  ;;  %v872_v39 = vrot.slane %v871_v21, 1  ;;  %v1013_v41 = vsel %vm1012_vm8, %v860_v36, %v1011_v34 }
 0x32b   :  { %v2273_v62 = vmul.f32 %v1436_v43, %v2428_v33  ;;  %v874_v44 = vsel %vm769_vm2, %v2065_v63, 0.0  ;;  %v875_v50 = vsel %vm769_vm2, %v2150_v16, 0.0  ;;  %v877_v18 = vsel %vm769_vm2, %v2180_v61, 0.0 }
 0x32c   :  { %v879_v49 = vsel %vm769_vm2, %v740_v1, 0.0  ;;  %v887_v7 = vsel %vm769_vm2, %v2071_v3, 0.0  ;;  %v873_v55 = vadd.f32 %v872_v39, %v871_v21  ;;  %v876_v23 = vadd.f32 %v875_v50, %v874_v44 }
 0x32d   :  { %v888_v33 = vsel %vm769_vm2, %v2156_v35, 0.0  ;;  %v890_v24 = vsel %vm769_vm2, %v2184_v14, 0.0  ;;  %v892_v30 = vsel %vm769_vm2, %v744_v22, 0.0  ;;  %v900_v16 = vsel %vm769_vm2, %v2202_v45, 0.0 }
 0x32e   :  { %v889_v63 = vadd.f32 %v888_v33, %v887_v7  ;;  %v901_v61 = vsel %vm769_vm2, %v2206_v60, 0.0  ;;  %v1015_v1 = vsel %vm1014_vm9, %v873_v55, %v1013_v41  ;;  %v878_v3 = vadd.f32 %v877_v18, %v876_v23 }
 0x32f   :  { %v902_v29 = vadd.f32 %v901_v61, %v900_v16  ;;  %v903_v12 = vsel %vm769_vm2, %v747_v56, 0.0  ;;  %v2297_v35 = vsel %vm2224_vm10, %v1015_v1, -1000000.0  ;;  %v905_v54 = vsel %vm769_vm2, %v748_v57, 0.0 }
 0x330   :  { %v891_v14 = vadd.f32 %v890_v24, %v889_v63  ;;  %v913_v22 = vsel %vm769_vm2, %v2213_v2, 0.0  ;;  %v1035_v45 = vsel %vm769_vm2, %v2297_v35, -inf  ;;  %v880_v60 = vadd.f32 %v879_v49, %v878_v3 }
 0x331   :  { %v904_v51 = vadd.f32 %v903_v12, %v902_v29  ;;  %v914_v46 = vsel %vm769_vm2, %v750_v8, 0.0  ;;  %1036 = vmax.xlane.f32.xlu0 %v1035_v45  ;;  %v916_v48 = vsel %vm769_vm2, %v751_v38, 0.0  ;;  %v918_v58 = vsel %vm769_vm2, %v752_v4, 0.0 }
 0x332   :  { %v893_v27 = vadd.f32 %v892_v30, %v891_v14  ;;  %v915_v56 = vadd.f32 %v914_v46, %v913_v22  ;;  %v881_v53 = vrot.slane %v880_v60, 4  ;;  %v926_v57 = vsel %vm769_vm2, %v753_v0, 0.0 }
 0x333   :  { %v906_v15 = vadd.f32 %v905_v54, %v904_v51  ;;  %v927_v2 = vsel %vm769_vm2, %v754_v52, 0.0  ;;  %v929_v13 = vsel %vm769_vm2, %v755_v47, 0.0  ;;  %v931_v43 = vsel %vm769_vm2, %v756_v37, 0.0 }
 0x334   :  { %v894_v9 = vrot.slane %v893_v27, 4  ;;  %v917_v10 = vadd.f32 %v916_v48, %v915_v56  ;;  %v928_v25 = vadd.f32 %v927_v2, %v926_v57  ;;  %v882_v40 = vadd.f32 %v881_v53, %v880_v60 }
 0x335   :  { %v907_v8 = vrot.slane %v906_v15, 4  ;;  %v939_v34 = vsel %vm769_vm2, %v757_v5, 0.0  ;;  %v940_v21 = vsel %vm769_vm2, %v758_v19, 0.0  ;;  %v942_v52 = vsel %vm769_vm2, %v2241_v28, 0.0 }
 0x336   :  { %v895_v38 = vadd.f32 %v894_v9, %v893_v27  ;;  %v919_v36 = vadd.f32 %v918_v58, %v917_v10  ;;  %v930_v4 = vadd.f32 %v929_v13, %v928_v25  ;;  %v883_v39 = vrot.slane %v882_v40, 2 }
 0x337   :  { %v908_v0 = vadd.f32 %v907_v8, %v906_v15  ;;  %v941_v41 = vadd.f32 %v940_v21, %v939_v34  ;;  %v944_v18 = vsel %vm769_vm2, %v2244_v59, 0.0  ;;  %v952_v7 = vsel %vm769_vm2, %v2248_v6, 0.0 }
 0x338   :  { %v896_v44 = vrot.slane %v895_v38, 2  ;;  %v920_v50 = vrot.slane %v919_v36, 4  ;;  %v932_v47 = vadd.f32 %v931_v43, %v930_v4  ;;  %v884_v37 = vadd.f32 %v883_v39, %v882_v40 }
 0x339   :  { %v909_v49 = vrot.slane %v908_v0, 2  ;;  %v943_v5 = vadd.f32 %v942_v52, %v941_v41  ;;  %v953_v33 = vsel %vm769_vm2, %v2252_v17, 0.0  ;;  %v955_v59 = vsel %vm769_vm2, %v2255_v31, 0.0 }
 0x33a   :  { %v897_v55 = vadd.f32 %v896_v44, %v895_v38  ;;  %v921_v19 = vadd.f32 %v920_v50, %v919_v36  ;;  %v933_v23 = vrot.slane %v932_v47, 4  ;;  %v885_v24 = vrot.slane %v884_v37, 1 }
 0x33b   :  { %v910_v28 = vadd.f32 %v909_v49, %v908_v0  ;;  %v945_v63 = vadd.f32 %v944_v18, %v943_v5  ;;  %v954_v30 = vadd.f32 %v953_v33, %v952_v7  ;;  %v957_v17 = vsel %vm769_vm2, %v2258_v11, 0.0 }
 0x33c   :  { %v898_v16 = vrot.slane %v897_v55, 1  ;;  %v922_v61 = vrot.slane %v921_v19, 2  ;;  %v934_v1 = vadd.f32 %v933_v23, %v932_v47  ;;  %v886_v3 = vadd.f32 %v885_v24, %v884_v37 }
 0x33d   :  { %v911_v29 = vrot.slane %v910_v28, 1  ;;  %v946_v12 = vrot.slane %v945_v63, 4  ;;  %v956_v6 = vadd.f32 %v955_v59, %v954_v30  ;;  %v965_v27 = vsel %vm769_vm2, %v2262_v20, 0.0 }
 0x33e   :  { %v899_v14 = vadd.f32 %v898_v16, %v897_v55  ;;  %v923_v54 = vadd.f32 %v922_v61, %v921_v19  ;;  %v935_v22 = vrot.slane %v934_v1, 2  ;;  %v966_v31 = vsel %vm769_vm2, %v2266_v32, 0.0  ;;  %v1065_v61 = vld [vmem:[#allocation4] sm:$0xff] }
 0x33f   :  { %v912_v45 = vadd.f32 %v911_v29, %v910_v28  ;;  %v947_v60 = vadd.f32 %v946_v12, %v945_v63  ;;  %v958_v51 = vadd.f32 %v957_v17, %v956_v6  ;;  %v968_v56 = vsel %vm769_vm2, %v2269_v42, 0.0  ;;  %v1066_v6 = vld [vmem:[#allocation4 + $0x8] sm:$0xff] }
 0x340   :  { %v936_v46 = vadd.f32 %v935_v22, %v934_v1  ;;  %v924_v48 = vrot.slane %v923_v54, 1  ;;  %v967_v15 = vadd.f32 %v966_v31, %v965_v27  ;;  %v970_v11 = vsel %vm769_vm2, %v2273_v62, 0.0 }
 0x341   :  { %v948_v58 = vrot.slane %v947_v60, 2  ;;  %v959_v53 = vrot.slane %v958_v51, 4  ;;  %v1016_v57 = vsel %vm1002_vm3, %v899_v14, %v886_v3  ;;  %v1029_v44 = vstv %s1253_s14 }
 0x342   :  { %v969_v10 = vadd.f32 %v968_v56, %v967_v15  ;;  %v937_v25 = vrot.slane %v936_v46, 1  ;;  %v1017_v20 = vsel %vm1004_vm4, %v912_v45, %v1016_v57  ;;  %v925_v13 = vadd.f32 %v924_v48, %v923_v54 }
 0x343   :  { %v949_v2 = vadd.f32 %v948_v58, %v947_v60  ;;  %v960_v9 = vadd.f32 %v959_v53, %v958_v51  ;;  %vm1030_vm11 = vcmp.lt.s32.totalorder %v2433_v26, %v1029_v44  ;;  %v1561_v16 = vmov 0.0  }
 0x344   :  { %v971_v40 = vadd.f32 %v970_v11, %v969_v10  ;;  %v1018_v34 = vsel %vm1006_vm5, %v925_v13, %v1017_v20  ;;  %v938_v38 = vadd.f32 %v937_v25, %v936_v46  ;;  %1276 = vmatprep.subr.mxu1 %v1561_v16  ;;  %1278 = vmatprep.mubr.msk.f32.mxu1 %vm1562_vm12, %v1561_v16 }
 0x345   :  { %v961_v32 = vrot.slane %v960_v9, 2  ;;  %v950_v42 = vrot.slane %v949_v2, 1  ;;  %1277 = vmatpush3.msra.mxu1 %v1065_v61 }
 0x346   :  { %v972_v43 = vrot.slane %v971_v40, 4  ;;  %v1019_v4 = vsel %vm1008_vm6, %v938_v38, %v1018_v34  ;;  %1281 = vmatprep.subr.mxu1 %v1561_v16 }
 0x347   :  { %v962_v8 = vadd.f32 %v961_v32, %v960_v9  ;;  %v951_v21 = vadd.f32 %v950_v42, %v949_v2 }
 0x348   :  { %v973_v36 = vadd.f32 %v972_v43, %v971_v40 }
 0x349   :  { %v963_v62 = vrot.slane %v962_v8, 1  ;;  %v1020_v41 = vsel %vm1010_vm7, %v951_v21, %v1019_v4 }
 0x34a   :  { %v974_v39 = vrot.slane %v973_v36, 2 }
 0x34b   :  { %v964_v52 = vadd.f32 %v963_v62, %v962_v8 }
 0x34c   :  { %v975_v0 = vadd.f32 %v974_v39, %v973_v36 }
 0x34d   :  { %v1021_v47 = vsel %vm1012_vm8, %v964_v52, %v1020_v41 }
 0x34e   :  { %v976_v50 = vrot.slane %v975_v0, 1 }
 0x350   :  { %v977_v18 = vadd.f32 %v976_v50, %v975_v0 }
 0x352   :  { %v1022_v37 = vsel %vm1014_vm9, %v977_v18, %v1021_v47 }
 0x353   :  { %v1034_v49 = vsel %vm1030_vm11, %v1022_v37, -1000000.0 }
 0x354   :  { %v1038_v5 = vsel %vm769_vm2, %v1034_v49, -inf }
 0x355   :  { %1039 = vmax.xlane.f32.xlu1 %v1038_v5 }
 0x3be   :  { %v1037_v7 = vpop.xlane.xlu0 %1036 }
 0x3bf   :  { %v1041_v55 = vsub.f32 %v2297_v35, %v1037_v7 }
 0x3c1   :  { %v1043_v19 = vmul.f32 1.442695, %v1041_v55 }
 0x3c3   :  { %1437 = vpow2.f32 %v1043_v19 }
 0x3cd   :  { %v1438_v23 = vpop.eup %1437 }
 0x3ce   :  { %v1047_v33 = vsel %vm769_vm2, %v1438_v23, 0.0 }
 0x3cf   :  { %1048 = vadd.xlane.f32.xlu0 %v1047_v33 }
 0x3e2   :  { %v1040_v24 = vpop.xlane.xlu1 %1039 }
 0x3e3   :  { %v1042_v28 = vsub.f32 %v1034_v49, %v1040_v24 }
 0x3e5   :  { %v1045_v63 = vmul.f32 1.442695, %v1042_v28 }
 0x3e7   :  { %1439 = vpow2.f32 %v1045_v63 }
 0x3f1   :  { %v1440_v26 = vpop.eup %1439 }
 0x3f2   :  { %v1050_v30 = vsel %vm769_vm2, %v1440_v26, 0.0 }
 0x3f3   :  { %1051 = vadd.xlane.f32.xlu0 %v1050_v30 }
 0x45c   :  { %v1049_v35 = vpop.xlane.xlu0 %1048 }
 0x45d   :  { %1441 = vrcp.f32 %v1049_v35 }
 0x467   :  { %v1442_v1 = vpop.eup %1441 }
 0x468   :  { %v1055_v59 = vmul.f32 %v1442_v1, %v1049_v35 }
 0x46a   :  { %v1057_v3 = vsub.f32 2.0, %v1055_v59 }
 0x46c   :  { %v1059_v29 = vmul.f32 %v1442_v1, %v1057_v3 }
 0x46e   :  { %v1061_v12 = vmul.f32 %v1438_v23, %v1059_v29 }
 0x470   :  { %1063 = vst.msk [vmem:[#allocation10] sm:$0xff] %vm769_vm2, %v1061_v12  ;;  %1279 = vmatmul.mubr.msk.f32.vlgmr.msra.gmra.mrb[0].mxu1 %vm769_vm2, %v1061_v12 }
 0x471   :  { %1282 = vmatpush3.msra.mxu1 %v1066_v6  ;;  %1283 = vmatprep.mubr.msk.f32.mxu1 %vm1562_vm12, %v1561_v16 }
 0x480   :  { %v1052_v14 = vpop.xlane.xlu0 %1051 }
 0x481   :  { %1443 = vrcp.f32 %v1052_v14 }
 0x48b   :  { %v1444_v54 = vpop.eup %1443 }
 0x48c   :  { %v1056_v22 = vmul.f32 %v1444_v54, %v1052_v14 }
 0x48e   :  { %v1058_v17 = vsub.f32 2.0, %v1056_v22 }
 0x490   :  { %v1060_v45 = vmul.f32 %v1444_v54, %v1058_v17 }
 0x492   :  { %v1062_v60 = vmul.f32 %v1440_v26, %v1060_v45 }
 0x494   :  { %1064 = vst.msk [vmem:[#allocation10 + $0x8] sm:$0xff] %vm769_vm2, %v1062_v60  ;;  %1284 = vmatmul.mubr.msk.f32.vlgmr.msra.gmra.mrb[2].mxu1 %vm769_vm2, %v1062_v60 }
 0x495   :  { %1510 = shalt.err (!%p1507_p9)
}
 0x496   :  { %s1511_s19 = scalar_lea.hbm %s2389_s8, 256 }
 0x497   :  { %p1512_p10 = scmp.ne.s32.totalorder %s2389_s8, %s1511_s19  ;;  %p1515_p11 = scmp.lt.u32.totalorder %s1511_s19, %s2389_s8 }
 0x499   :  { %p1517_p12 = pnand %p1515_p11, %p1512_p10 }
 0x49b   :  { %1520 = shalt.err (!%p1517_p12)
}
 0x49c   :  { %1238 = dma.vmem_to_hbm [thread:$0]  %s1233_s3, 256, %s2389_s8, [#allocation11], %s1555_s24, %s1555_s24, %s1556_s25  }
 0x49d   :  { %s1564_s26 = smov [#allocation9]  }
 0x49e   :  { %s1220_s27 = sshll.u32 %s1564_s26, 4  ;;  %s1221_s27 = int_to_ptr.vmem [resolvable:$true] %s1220_s27 }
 0x49f   :  { %s1521_s28 = scalar_lea.vmem %s1221_s27, 256  ;;  %p1526_p0 = scmp.lt.s32.totalorder %s1221_s27, %s1221_s27 }
 0x4a0   :  { %p1522_p13 = scmp.ne.s32.totalorder %s1221_s27, %s1521_s28  ;;  %p1527_p1 = scmp.lt.s32.totalorder %s1521_s28, %s1521_s28 }
 0x4a2   :  { %p1528_p2 = por %p1527_p1, %p1526_p0 }
 0x4a4   :  { %p1529_p3 = pnand %p1528_p2, %p1522_p13 }
 0x543   :  { %v1136_v51 = vpop.f32.mrb[0].mxu1 }
 0x544   :  { %1213 = vst.msk [vmem:[#allocation9] sm:$0xff] %vm79_vm0, %v1136_v51  ;;  %v1280_v46 = vpop.f32.mrb[1].mxu1 }
 0x567   :  { %v1209_v27 = vpop.f32.mrb[2].mxu1 }
 0x568   :  { %1214 = vst.msk [vmem:[#allocation9 + $0x8] sm:$0xff] %vm79_vm0, %v1209_v27  ;;  %v1285_v31 = vpop.f32.mrb[3].mxu1 }
 0x569   :  { %1532 = shalt.err (!%p1529_p3)
}
 0x56a   :  { %s1533_s30 = scalar_lea.hbm %s2388_s7, 256 }
 0x56b   :  { %p1534_p4 = scmp.ne.s32.totalorder %s2388_s7, %s1533_s30  ;;  %p1537_p5 = scmp.lt.u32.totalorder %s1533_s30, %s2388_s7 }
 0x56d   :  { %p1539_p6 = pnand %p1537_p5, %p1534_p4 }
 0x56f   :  { %1542 = shalt.err (!%p1539_p6)
}
 0x570   :  { %1226 = dma.vmem_to_hbm [thread:$0]  %s1221_s27, 256, %s2388_s7, [#allocation6], %s1555_s24, %s1555_s24, %s1556_s25  }
 0x571   :  { %1549 = dma.done.wait [#allocation6], 256  }
 0x572   :  { %1550 = vsyncadd [#allocation6], 4294967040 }
 0x573   :  { %1551 = dma.done.wait [#allocation11], 256  }
 0x574   :  { %1552 = vsyncadd [#allocation11], 4294967040 }
 0x575   :  { %1245 = vsyncpa [#allocation5], 1 }
 0x576   :  { %1246 = vsyncpa [#allocation8], 1 }
 0x577   :  { %1247 = vsyncpa [#allocation6], 1 }
 0x578   :  { %1248 = vsyncpa [#allocation11], 1 }

</bundles_post_ra>
